<compile_context>
chip_gen: v5e
topology: v5e:2x2
jax: 0.10.0
libtpu: 0.0.40
codegen_flags: <defaults>
</compile_context>

<pallas_src>
import numpy as np
import jax
import jax.numpy as jnp
from jax import lax
from jax.experimental import pallas as pl
from jax.experimental.pallas import tpu as pltpu

# Small, PyTorch-module-consistent shapes
B, CIN, H, W = 2, 4, 16, 16
COUT, KH, KW = 8, 3, 3
Hp, Wp = H + KH - 1, W + KW - 1            # SAME-padded spatial: 18 x 18


def _round_up(x, m):
    return -(-x // m) * m


# Lane layout of the padded input slab:
#   xs[cin, b*SEG + r*Wp + c] = x_pad[b, cin, r, c]   (zeros elsewhere)
SEG = _round_up(Hp * Wp, 128)                               # 384 lanes / batch
L_OUT = _round_up((B - 1) * SEG + Hp * Wp, 128)             # 768 output lanes
LANES = _round_up(max(L_OUT + (KH - 1) * Wp + (KW - 1),     # 896 input lanes
                      B * SEG), 128)


def _build_pool_matrix():
    """(B, L_OUT) matrix: 1/(H*W) at valid output lanes of batch b, else 0.

    Baked-in mask: padded / out-of-range lanes (which hold garbage conv
    outputs) contribute exactly 0 to the pooled mean.
    """
    pool = np.zeros((B, L_OUT), np.float32)
    inv_hw = 1.0 / (H * W)
    for b in range(B):
        for h in range(H):
            base = b * SEG + h * Wp
            pool[b, base:base + W] = inv_hw
    return jnp.asarray(pool)


_POOL = _build_pool_matrix()


def feature_kernel(xs_ref, w_ref, b_ref, pool_ref, o_ref):
    """xs_ref:   (CIN, LANES)        zero-padded, lane-dense input slab
       w_ref:    (KH*KW, COUT, CIN)  tap-major conv weights
       b_ref:    (COUT, 1)           conv bias (sublane layout)
       pool_ref: (B, L_OUT)          average-pool matrix (mask folded in)
       o_ref:    (B, COUT)           pooled features (final layout, no wrapper T)
    """
    # ---- fused im2col + conv: 9 lane-offset taps accumulated on the MXU ----
    acc = jnp.zeros((COUT, L_OUT), jnp.float32)
    for kh in range(KH):                                   # static 3x3 unroll
        for kw in range(KW):
            s = kh * Wp + kw                               # static lane offset
            tap = xs_ref[:, s:s + L_OUT]                   # (CIN, L_OUT)
            acc = acc + jnp.dot(w_ref[kh * KW + kw], tap,  # (COUT,CIN)x(CIN,L)
                                preferred_element_type=jnp.float32)

    # ---- bias + ReLU in the f32 accumulator domain (VPU) ----
    y = jnp.maximum(acc + b_ref[...], 0.0)                 # (COUT, L_OUT)

    # ---- AdaptiveAvgPool2d(1) as a transposed-RHS matmul; emits (B, COUT) ----
    # out[b, co] = sum_l pool[b, l] * y[co, l]
    o_ref[...] = lax.dot_general(
        pool_ref[...], y,
        dimension_numbers=(((1,), (1,)), ((), ())),
        preferred_element_type=jnp.float32)


@jax.jit
def feature_extractor(x_nchw, w_oihw, bias):
    """Pallas-backed FeatureExtractor.forward.

    x_nchw : (B, CIN, H, W)       float32  (PyTorch NCHW convention)
    w_oihw : (COUT, CIN, KH, KW)  conv weight (PyTorch OIHW convention)
    bias   : (COUT,)              conv bias
    returns: (B, COUT) float32
    """
    # Minimal wrapper prep (~14 KiB, one small XLA fusion): SAME zero-pad and
    # flatten to a lane-dense slab; all tap construction happens in-kernel.
    x_pad = jnp.pad(x_nchw, ((0, 0), (0, 0), (1, 1), (1, 1)))      # (B,CIN,Hp,Wp)
    xs = jnp.transpose(x_pad, (1, 0, 2, 3)).reshape(CIN, B, Hp * Wp)
    xs = jnp.pad(xs, ((0, 0), (0, 0), (0, SEG - Hp * Wp)))
    xs = xs.reshape(CIN, B * SEG)
    xs = jnp.pad(xs, ((0, 0), (0, LANES - B * SEG)))                # (CIN, LANES)

    # Tiny tap-major weight reshuffle (288 floats): w_taps[t, co, cin].
    w_taps = jnp.transpose(w_oihw, (2, 3, 0, 1)).reshape(KH * KW, COUT, CIN)
    b2 = bias.reshape(COUT, 1)

    return pl.pallas_call(
        feature_kernel,
        out_shape=jax.ShapeDtypeStruct((B, COUT), jnp.float32),
        in_specs=[
            pl.BlockSpec(memory_space=pltpu.MemorySpace.VMEM),
            pl.BlockSpec(memory_space=pltpu.MemorySpace.VMEM),
            pl.BlockSpec(memory_space=pltpu.MemorySpace.VMEM),
            pl.BlockSpec(memory_space=pltpu.MemorySpace.VMEM),
        ],
        out_specs=pl.BlockSpec(memory_space=pltpu.MemorySpace.VMEM),
    )(xs.astype(jnp.float32), w_taps.astype(jnp.float32),
      b2.astype(jnp.float32), _POOL)


def _reference(x_nchw, w_oihw, bias):
    """Plain-JAX reference (conv -> relu -> global avg pool -> flatten)."""
    y = lax.conv_general_dilated(
        x_nchw, w_oihw, window_strides=(1, 1), padding="SAME",
        dimension_numbers=("NCHW", "OIHW", "NCHW"),
    ) + bias.reshape(1, COUT, 1, 1)
    y = jnp.maximum(y, 0.0)
    return jnp.mean(y, axis=(2, 3))                                 # (B, COUT)


if __name__ == "__main__":
    key = jax.random.PRNGKey(0)
    kx, kw, kb = jax.random.split(key, 3)

    x = jax.random.normal(kx, (B, CIN, H, W), dtype=jnp.float32)
    fan_in = CIN * KH * KW
    w = jax.random.uniform(kw, (COUT, CIN, KH, KW), jnp.float32,
                           minval=-1.0, maxval=1.0) / jnp.sqrt(fan_in)
    bias = jax.random.uniform(kb, (COUT,), jnp.float32,
                              minval=-1.0, maxval=1.0) / jnp.sqrt(fan_in)

    out = jax.block_until_ready(feature_extractor(x, w, bias))
    ref = jax.block_until_ready(_reference(x, w, bias))

    assert out.shape == (B, COUT)
    assert jnp.allclose(out, ref, atol=2e-3, rtol=2e-3), "mismatch vs reference"
    print("KERNEL_OK")
</pallas_src>

<mosaic_0001>
module attributes {stable_mosaic.version = 11 : i64} {
  func.func @feature_kernel(%arg0: memref<4x896xf32, #tpu.memory_space<vmem>>, %arg1: memref<9x8x4xf32, #tpu.memory_space<vmem>>, %arg2: memref<8x1xf32, #tpu.memory_space<vmem>>, %arg3: memref<2x768xf32, #tpu.memory_space<vmem>>, %arg4: memref<2x8xf32, #tpu.memory_space<vmem>>) attributes {dimension_semantics = [], scalar_prefetch = 0 : i64, scratch_operands = 0 : i64, tpu.core_type = #tpu.core_type<tc>} {
    %cst = arith.constant 0.000000e+00 : f32
    %0 = vector.broadcast %cst : f32 to vector<8x768xf32>
    %c0 = arith.constant 0 : index
    %c0_0 = arith.constant 0 : index
    %1 = vector.load %arg0[%c0, %c0_0] : memref<4x896xf32, #tpu.memory_space<vmem>>, vector<4x768xf32>
    %c0_1 = arith.constant 0 : index
    %c0_2 = arith.constant 0 : index
    %c0_3 = arith.constant 0 : index
    %2 = vector.load %arg1[%c0_1, %c0_2, %c0_3] : memref<9x8x4xf32, #tpu.memory_space<vmem>>, vector<1x8x4xf32>
    %3 = vector.shape_cast %2 : vector<1x8x4xf32> to vector<8x4xf32>
    %cst_4 = arith.constant dense<0.000000e+00> : vector<8x768xf32>
    %4 = tpu.matmul %3, %1, %cst_4 {dimension_numbers = #tpu.dot_dimension_numbers<[1], [0], [0], [1], [0, 0, 1, 1], [], []>} : vector<8x4xf32>, vector<4x768xf32>, vector<8x768xf32> -> vector<8x768xf32>
    %5 = arith.addf %0, %4 : vector<8x768xf32>
    %c0_5 = arith.constant 0 : index
    %c1 = arith.constant 1 : index
    %6 = vector.load %arg0[%c0_5, %c1] : memref<4x896xf32, #tpu.memory_space<vmem>>, vector<4x768xf32>
    %c1_6 = arith.constant 1 : index
    %c0_7 = arith.constant 0 : index
    %c0_8 = arith.constant 0 : index
    %7 = vector.load %arg1[%c1_6, %c0_7, %c0_8] : memref<9x8x4xf32, #tpu.memory_space<vmem>>, vector<1x8x4xf32>
    %8 = vector.shape_cast %7 : vector<1x8x4xf32> to vector<8x4xf32>
    %cst_9 = arith.constant dense<0.000000e+00> : vector<8x768xf32>
    %9 = tpu.matmul %8, %6, %cst_9 {dimension_numbers = #tpu.dot_dimension_numbers<[1], [0], [0], [1], [0, 0, 1, 1], [], []>} : vector<8x4xf32>, vector<4x768xf32>, vector<8x768xf32> -> vector<8x768xf32>
    %10 = arith.addf %5, %9 : vector<8x768xf32>
    %c0_10 = arith.constant 0 : index
    %c2 = arith.constant 2 : index
    %11 = vector.load %arg0[%c0_10, %c2] : memref<4x896xf32, #tpu.memory_space<vmem>>, vector<4x768xf32>
    %c2_11 = arith.constant 2 : index
    %c0_12 = arith.constant 0 : index
    %c0_13 = arith.constant 0 : index
    %12 = vector.load %arg1[%c2_11, %c0_12, %c0_13] : memref<9x8x4xf32, #tpu.memory_space<vmem>>, vector<1x8x4xf32>
    %13 = vector.shape_cast %12 : vector<1x8x4xf32> to vector<8x4xf32>
    %cst_14 = arith.constant dense<0.000000e+00> : vector<8x768xf32>
    %14 = tpu.matmul %13, %11, %cst_14 {dimension_numbers = #tpu.dot_dimension_numbers<[1], [0], [0], [1], [0, 0, 1, 1], [], []>} : vector<8x4xf32>, vector<4x768xf32>, vector<8x768xf32> -> vector<8x768xf32>
    %15 = arith.addf %10, %14 : vector<8x768xf32>
    %c0_15 = arith.constant 0 : index
    %c18 = arith.constant 18 : index
    %16 = vector.load %arg0[%c0_15, %c18] : memref<4x896xf32, #tpu.memory_space<vmem>>, vector<4x768xf32>
    %c3 = arith.constant 3 : index
    %c0_16 = arith.constant 0 : index
    %c0_17 = arith.constant 0 : index
    %17 = vector.load %arg1[%c3, %c0_16, %c0_17] : memref<9x8x4xf32, #tpu.memory_space<vmem>>, vector<1x8x4xf32>
    %18 = vector.shape_cast %17 : vector<1x8x4xf32> to vector<8x4xf32>
    %cst_18 = arith.constant dense<0.000000e+00> : vector<8x768xf32>
    %19 = tpu.matmul %18, %16, %cst_18 {dimension_numbers = #tpu.dot_dimension_numbers<[1], [0], [0], [1], [0, 0, 1, 1], [], []>} : vector<8x4xf32>, vector<4x768xf32>, vector<8x768xf32> -> vector<8x768xf32>
    %20 = arith.addf %15, %19 : vector<8x768xf32>
    %c0_19 = arith.constant 0 : index
    %c19 = arith.constant 19 : index
    %21 = vector.load %arg0[%c0_19, %c19] : memref<4x896xf32, #tpu.memory_space<vmem>>, vector<4x768xf32>
    %c4 = arith.constant 4 : index
    %c0_20 = arith.constant 0 : index
    %c0_21 = arith.constant 0 : index
    %22 = vector.load %arg1[%c4, %c0_20, %c0_21] : memref<9x8x4xf32, #tpu.memory_space<vmem>>, vector<1x8x4xf32>
    %23 = vector.shape_cast %22 : vector<1x8x4xf32> to vector<8x4xf32>
    %cst_22 = arith.constant dense<0.000000e+00> : vector<8x768xf32>
    %24 = tpu.matmul %23, %21, %cst_22 {dimension_numbers = #tpu.dot_dimension_numbers<[1], [0], [0], [1], [0, 0, 1, 1], [], []>} : vector<8x4xf32>, vector<4x768xf32>, vector<8x768xf32> -> vector<8x768xf32>
    %25 = arith.addf %20, %24 : vector<8x768xf32>
    %c0_23 = arith.constant 0 : index
    %c20 = arith.constant 20 : index
    %26 = vector.load %arg0[%c0_23, %c20] : memref<4x896xf32, #tpu.memory_space<vmem>>, vector<4x768xf32>
    %c5 = arith.constant 5 : index
    %c0_24 = arith.constant 0 : index
    %c0_25 = arith.constant 0 : index
    %27 = vector.load %arg1[%c5, %c0_24, %c0_25] : memref<9x8x4xf32, #tpu.memory_space<vmem>>, vector<1x8x4xf32>
    %28 = vector.shape_cast %27 : vector<1x8x4xf32> to vector<8x4xf32>
    %cst_26 = arith.constant dense<0.000000e+00> : vector<8x768xf32>
    %29 = tpu.matmul %28, %26, %cst_26 {dimension_numbers = #tpu.dot_dimension_numbers<[1], [0], [0], [1], [0, 0, 1, 1], [], []>} : vector<8x4xf32>, vector<4x768xf32>, vector<8x768xf32> -> vector<8x768xf32>
    %30 = arith.addf %25, %29 : vector<8x768xf32>
    %c0_27 = arith.constant 0 : index
    %c36 = arith.constant 36 : index
    %31 = vector.load %arg0[%c0_27, %c36] : memref<4x896xf32, #tpu.memory_space<vmem>>, vector<4x768xf32>
    %c6 = arith.constant 6 : index
    %c0_28 = arith.constant 0 : index
    %c0_29 = arith.constant 0 : index
    %32 = vector.load %arg1[%c6, %c0_28, %c0_29] : memref<9x8x4xf32, #tpu.memory_space<vmem>>, vector<1x8x4xf32>
    %33 = vector.shape_cast %32 : vector<1x8x4xf32> to vector<8x4xf32>
    %cst_30 = arith.constant dense<0.000000e+00> : vector<8x768xf32>
    %34 = tpu.matmul %33, %31, %cst_30 {dimension_numbers = #tpu.dot_dimension_numbers<[1], [0], [0], [1], [0, 0, 1, 1], [], []>} : vector<8x4xf32>, vector<4x768xf32>, vector<8x768xf32> -> vector<8x768xf32>
    %35 = arith.addf %30, %34 : vector<8x768xf32>
    %c0_31 = arith.constant 0 : index
    %c37 = arith.constant 37 : index
    %36 = vector.load %arg0[%c0_31, %c37] : memref<4x896xf32, #tpu.memory_space<vmem>>, vector<4x768xf32>
    %c7 = arith.constant 7 : index
    %c0_32 = arith.constant 0 : index
    %c0_33 = arith.constant 0 : index
    %37 = vector.load %arg1[%c7, %c0_32, %c0_33] : memref<9x8x4xf32, #tpu.memory_space<vmem>>, vector<1x8x4xf32>
    %38 = vector.shape_cast %37 : vector<1x8x4xf32> to vector<8x4xf32>
    %cst_34 = arith.constant dense<0.000000e+00> : vector<8x768xf32>
    %39 = tpu.matmul %38, %36, %cst_34 {dimension_numbers = #tpu.dot_dimension_numbers<[1], [0], [0], [1], [0, 0, 1, 1], [], []>} : vector<8x4xf32>, vector<4x768xf32>, vector<8x768xf32> -> vector<8x768xf32>
    %40 = arith.addf %35, %39 : vector<8x768xf32>
    %c0_35 = arith.constant 0 : index
    %c38 = arith.constant 38 : index
    %41 = vector.load %arg0[%c0_35, %c38] : memref<4x896xf32, #tpu.memory_space<vmem>>, vector<4x768xf32>
    %c8 = arith.constant 8 : index
    %c0_36 = arith.constant 0 : index
    %c0_37 = arith.constant 0 : index
    %42 = vector.load %arg1[%c8, %c0_36, %c0_37] : memref<9x8x4xf32, #tpu.memory_space<vmem>>, vector<1x8x4xf32>
    %43 = vector.shape_cast %42 : vector<1x8x4xf32> to vector<8x4xf32>
    %cst_38 = arith.constant dense<0.000000e+00> : vector<8x768xf32>
    %44 = tpu.matmul %43, %41, %cst_38 {dimension_numbers = #tpu.dot_dimension_numbers<[1], [0], [0], [1], [0, 0, 1, 1], [], []>} : vector<8x4xf32>, vector<4x768xf32>, vector<8x768xf32> -> vector<8x768xf32>
    %45 = arith.addf %40, %44 : vector<8x768xf32>
    %c0_39 = arith.constant 0 : index
    %c0_40 = arith.constant 0 : index
    %46 = vector.load %arg2[%c0_39, %c0_40] : memref<8x1xf32, #tpu.memory_space<vmem>>, vector<8x1xf32>
    %47 = vector.broadcast %46 : vector<8x1xf32> to vector<8x768xf32>
    %48 = arith.addf %45, %47 : vector<8x768xf32>
    %cst_41 = arith.constant 0.000000e+00 : f32
    %49 = vector.broadcast %cst_41 : f32 to vector<8x768xf32>
    %50 = arith.maximumf %48, %49 : vector<8x768xf32>
    %c0_42 = arith.constant 0 : index
    %c0_43 = arith.constant 0 : index
    %51 = vector.load %arg3[%c0_42, %c0_43] : memref<2x768xf32, #tpu.memory_space<vmem>>, vector<2x768xf32>
    %cst_44 = arith.constant dense<0.000000e+00> : vector<2x8xf32>
    %52 = tpu.matmul %51, %50, %cst_44 {dimension_numbers = #tpu.dot_dimension_numbers<[1], [1], [0], [0], [0, 0, 1, 0], [], []>} : vector<2x768xf32>, vector<8x768xf32>, vector<2x8xf32> -> vector<2x8xf32>
    %c0_45 = arith.constant 0 : index
    %c0_46 = arith.constant 0 : index
    %53 = vector.load %arg4[%c0_45, %c0_46] : memref<2x8xf32, #tpu.memory_space<vmem>>, vector<2x8xf32>
    tpu.vector_store %arg4[%c0_45, %c0_46], %52 {strides = array<i32>} : memref<2x8xf32, #tpu.memory_space<vmem>>, vector<2x8xf32>,
    return
  }
}

</mosaic_0001>

<bundles_post_ra>
// kernel: feature_extractor.1
= control target key start
LH: loop header
LB: loop body
LE: loop exit
PB: predicated region body
PF: predicated region fallthrough
CT: control target
= control target key end

     0   :  { %s2326_s0 = inlined_call_operand.vmem [shape: f32[4,896], index: 0, kind: input, shape index: {}]   ;;  %s2327_s1 = inlined_call_operand.vmem [shape: f32[9,8,4], index: 1, kind: input, shape index: {}]   ;;  %s2328_s2 = inlined_call_operand.vmem [shape: f32[8,1], index: 2, kind: input, shape index: {}]   ;;  %s2329_s3 = inlined_call_operand.vmem [shape: f32[2,768], index: 3, kind: input, shape index: {}]   ;;  %s2330_s4 = inlined_call_operand.hbm [shape: f32[2,8], index: 4, kind: output, shape index: {}]  }
   0x1   :  { %v2022_v0 = vld [vmem:[%s2326_s0 + $0x8] sm:$0xff]  ;;  %v2027_v1 = vld [vmem:[%s2326_s0] sm:$0xff]  ;;  %v25_v2 = vld [vmem:[%s2326_s0 + $0x18] sm:$0xf] }
   0x2   :  { %34 = vst [vmem:[#allocation1 + $0x10] ss:$2 sm:$0xff] %v2022_v0  ;;  %v2036_v3 = vld [vmem:[%s2326_s0 + $0x10] sm:$0xff] }
   0x3   :  { %32 = vst [vmem:[#allocation1] ss:$2 sm:$0xff] %v2027_v1 }
   0x4   :  { %9 = vsyncpa [#allocation3], 0  ;;  %38 = vst [vmem:[#allocation1 + $0x30] ss:$2 sm:$0xff] %v25_v2  ;;  %v356_v4 = vld [vmem:[%s2326_s0 + $0x18] sm:$0xf] }
   0x5   :  { %36 = vst [vmem:[#allocation1 + $0x20] ss:$2 sm:$0xff] %v2036_v3  ;;  %s1984_s25 = smov 127   ;;  %s1985_s26 = smov 126   ;;  %v542_v30 = vld [vmem:[%s2326_s0 + $0x18] sm:$0xf] }
   0x6   :  { %s1986_s29 = smov 110   ;;  %v728_v34 = vld [vmem:[%s2326_s0 + $0x18] sm:$0xf]  ;;  %s1987_s8 = smov 109   ;;  %vm71_vm0 = vcmask 1043456   ;;  %vm60_vm1 = vcmask 1039360  }
   0x7   :  { %v914_v38 = vld [vmem:[%s2326_s0 + $0x18] sm:$0xf]  ;;  %s1988_s11 = smov 108   ;;  %s1989_s14 = smov 92   ;;  %vm67_vm2 = vcmask 31744   ;;  %vm391_vm3 = vcmask 1031168  }
   0x8   :  { %v1100_v45 = vld [vmem:[%s2326_s0 + $0x18] sm:$0xf]  ;;  %s1990_s17 = smov 91   ;;  %s1991_s19 = smov 90   ;;  %vm577_vm4 = vcmask 900096   ;;  %vm763_vm5 = vcmask 891904  }
   0x9   :  { %v41_v5 = vld.sshfl [vmem:[#allocation1 + $0x10] sm:$0xff pattern:$0x75316420]  ;;  %v42_v6 = vld.sshfl [vmem:[#allocation1 + $0x18] sm:$0xff pattern:$0x75316420] }
   0xa   :  { %50 = vrot.lane.b32.xlu1 %v41_v5, %s1984_s25  ;;  %v39_v7 = vld.sshfl [vmem:[#allocation1] sm:$0xff pattern:$0x75316420]  ;;  %209 = vst [vmem:[#allocation1 + $0x10] ss:$2 sm:$0xff] %v2022_v0  ;;  %vm949_vm6 = vcmask 883712  }
   0xb   :  { %46 = vrot.lane.b32.xlu0 %v39_v7, %s1984_s25  ;;  %v40_v8 = vld.sshfl [vmem:[#allocation1 + $0x8] sm:$0xff pattern:$0x75316420]  ;;  %v45_v9 = vld.sshfl [vmem:[#allocation1 + $0x30] sm:$0xff pattern:$0x75316420] }
   0xc   :  { %207 = vst [vmem:[#allocation1] ss:$2 sm:$0xff] %v2027_v1  ;;  %v43_v10 = vld.sshfl [vmem:[#allocation1 + $0x20] sm:$0xff pattern:$0x75316420]  ;;  %vm1135_vm7 = vcmask 752640  }
   0xd   :  { %369 = vst [vmem:[#allocation1 + $0x30] ss:$2 sm:$0xff] %v356_v4  ;;  %54 = vrot.lane.b32.xlu2 %v43_v10, %s1984_s25  ;;  %v44_v11 = vld.sshfl [vmem:[#allocation1 + $0x28] sm:$0xff pattern:$0x75316420]  ;;  %vm1321_vm8 = vcmask 744448  }
   0xe   :  { %211 = vst [vmem:[#allocation1 + $0x20] ss:$2 sm:$0xff] %v2036_v3  ;;  %v1286_v58 = vld [vmem:[%s2326_s0 + $0x18] sm:$0xf]  ;;  %vm1507_vm9 = vcmask 736256   ;;  %vm1812_vm10 = vcmask 58368  }
   0xf   :  { %v1472_v61 = vld [vmem:[%s2326_s0 + $0x18] sm:$0xf] }
  0x11   :  { %v2046_v12 = vld.sshfl [vmem:[#allocation1 + $0x10] sm:$0xff pattern:$0x75316420]  ;;  %v2048_v13 = vld.sshfl [vmem:[#allocation1 + $0x18] sm:$0xff pattern:$0x75316420] }
  0x12   :  { %52 = vrot.lane.b32.xlu1 %v42_v6, %s1984_s25  ;;  %365 = vst [vmem:[#allocation1 + $0x10] ss:$2 sm:$0xff] %v2022_v0 }
  0x13   :  { %48 = vrot.lane.b32.xlu0 %v40_v8, %s1984_s25  ;;  %v2051_v14 = vld.sshfl [vmem:[#allocation1] sm:$0xff pattern:$0x75316420]  ;;  %v2053_v15 = vld.sshfl [vmem:[#allocation1 + $0x8] sm:$0xff pattern:$0x75316420] }
  0x14   :  { %363 = vst [vmem:[#allocation1] ss:$2 sm:$0xff] %v2027_v1  ;;  %v376_v31 = vld.sshfl [vmem:[#allocation1 + $0x30] sm:$0xff pattern:$0x75316420] }
  0x15   :  { %56 = vrot.lane.b32.xlu2 %v44_v11, %s1984_s25  ;;  %v2056_v16 = vld.sshfl [vmem:[#allocation1 + $0x20] sm:$0xff pattern:$0x75316420]  ;;  %v2058_v17 = vld.sshfl [vmem:[#allocation1 + $0x28] sm:$0xff pattern:$0x75316420] }
  0x16   :  { %367 = vst [vmem:[#allocation1 + $0x20] ss:$2 sm:$0xff] %v2036_v3 }
  0x17   :  { %555 = vst [vmem:[#allocation1 + $0x30] ss:$2 sm:$0xff] %v542_v30 }
  0x19   :  { %v372_v18 = vld.sshfl [vmem:[#allocation1 + $0x10] sm:$0xff pattern:$0x75316420]  ;;  %v373_v19 = vld.sshfl [vmem:[#allocation1 + $0x18] sm:$0xff pattern:$0x75316420] }
  0x1a   :  { %551 = vst [vmem:[#allocation1 + $0x10] ss:$2 sm:$0xff] %v2022_v0 }
  0x1b   :  { %58 = vrot.lane.b32.xlu0 %v45_v9, %s1984_s25  ;;  %v370_v20 = vld.sshfl [vmem:[#allocation1] sm:$0xff pattern:$0x75316420]  ;;  %v371_v21 = vld.sshfl [vmem:[#allocation1 + $0x8] sm:$0xff pattern:$0x75316420] }
  0x1c   :  { %377 = vrot.lane.b32.xlu1 %v370_v20, %s1985_s26  ;;  %549 = vst [vmem:[#allocation1] ss:$2 sm:$0xff] %v2027_v1 }
  0x1d   :  { %v375_v22 = vld.sshfl [vmem:[#allocation1 + $0x28] sm:$0xff pattern:$0x75316420]  ;;  %379 = vrot.lane.b32.xlu2 %v371_v21, %s1985_s26  ;;  %v374_v23 = vld.sshfl [vmem:[#allocation1 + $0x20] sm:$0xff pattern:$0x75316420] }
  0x1e   :  { %553 = vst [vmem:[#allocation1 + $0x20] ss:$2 sm:$0xff] %v2036_v3  ;;  %v562_v35 = vld.sshfl [vmem:[#allocation1 + $0x30] sm:$0xff pattern:$0x75316420] }
  0x1f   :  { %741 = vst [vmem:[#allocation1 + $0x30] ss:$2 sm:$0xff] %v728_v34 }
  0x21   :  { %v558_v26 = vld.sshfl [vmem:[#allocation1 + $0x10] sm:$0xff pattern:$0x75316420]  ;;  %v559_v27 = vld.sshfl [vmem:[#allocation1 + $0x18] sm:$0xff pattern:$0x75316420] }
  0x22   :  { %737 = vst [vmem:[#allocation1 + $0x10] ss:$2 sm:$0xff] %v2022_v0 }
  0x23   :  { %381 = vrot.lane.b32.xlu0 %v372_v18, %s1985_s26  ;;  %v557_v24 = vld.sshfl [vmem:[#allocation1 + $0x8] sm:$0xff pattern:$0x75316420]  ;;  %v556_v25 = vld.sshfl [vmem:[#allocation1] sm:$0xff pattern:$0x75316420] }
  0x24   :  { %383 = vrot.lane.b32.xlu1 %v373_v19, %s1985_s26  ;;  %735 = vst [vmem:[#allocation1] ss:$2 sm:$0xff] %v2027_v1  ;;  %v1830_v18 = vld [vmem:[%s2327_s1 + $0x8] sm:$0xff] }
  0x25   :  { %385 = vrot.lane.b32.xlu2 %v374_v23, %s1985_s26  ;;  %v561_v28 = vld.sshfl [vmem:[#allocation1 + $0x28] sm:$0xff pattern:$0x75316420]  ;;  %v560_v29 = vld.sshfl [vmem:[#allocation1 + $0x20] sm:$0xff pattern:$0x75316420] }
  0x26   :  { %739 = vst [vmem:[#allocation1 + $0x20] ss:$2 sm:$0xff] %v2036_v3  ;;  %v748_v39 = vld.sshfl [vmem:[#allocation1 + $0x30] sm:$0xff pattern:$0x75316420] }
  0x27   :  { %927 = vst [vmem:[#allocation1 + $0x30] ss:$2 sm:$0xff] %v914_v38 }
  0x29   :  { %v745_v36 = vld.sshfl [vmem:[#allocation1 + $0x18] sm:$0xff pattern:$0x75316420]  ;;  %v744_v37 = vld.sshfl [vmem:[#allocation1 + $0x10] sm:$0xff pattern:$0x75316420] }
  0x2a   :  { %923 = vst [vmem:[#allocation1 + $0x10] ss:$2 sm:$0xff] %v2022_v0 }
  0x2b   :  { %387 = vrot.lane.b32.xlu0 %v375_v22, %s1985_s26  ;;  %v743_v32 = vld.sshfl [vmem:[#allocation1 + $0x8] sm:$0xff pattern:$0x75316420]  ;;  %v742_v33 = vld.sshfl [vmem:[#allocation1] sm:$0xff pattern:$0x75316420] }
  0x2c   :  { %389 = vrot.lane.b32.xlu1 %v376_v31, %s1985_s26  ;;  %921 = vst [vmem:[#allocation1] ss:$2 sm:$0xff] %v2027_v1 }
  0x2d   :  { %563 = vrot.lane.b32.xlu2 %v556_v25, %s1986_s29  ;;  %v746_v40 = vld.sshfl [vmem:[#allocation1 + $0x20] sm:$0xff pattern:$0x75316420]  ;;  %v747_v43 = vld.sshfl [vmem:[#allocation1 + $0x28] sm:$0xff pattern:$0x75316420] }
  0x2e   :  { %925 = vst [vmem:[#allocation1 + $0x20] ss:$2 sm:$0xff] %v2036_v3  ;;  %v934_v44 = vld.sshfl [vmem:[#allocation1 + $0x30] sm:$0xff pattern:$0x75316420] }
  0x2f   :  { %1113 = vst [vmem:[#allocation1 + $0x30] ss:$2 sm:$0xff] %v1100_v45  ;;  %v1868_v45 = vld [vmem:[%s2327_s1 + $0x18] sm:$0xff] }
  0x31   :  { %v930_v41 = vld.sshfl [vmem:[#allocation1 + $0x10] sm:$0xff pattern:$0x75316420]  ;;  %v931_v42 = vld.sshfl [vmem:[#allocation1 + $0x18] sm:$0xff pattern:$0x75316420] }
  0x32   :  { %1109 = vst [vmem:[#allocation1 + $0x10] ss:$2 sm:$0xff] %v2022_v0 }
  0x33   :  { %565 = vrot.lane.b32.xlu0 %v557_v24, %s1986_s29  ;;  %v928_v46 = vld.sshfl [vmem:[#allocation1] sm:$0xff pattern:$0x75316420]  ;;  %v929_v47 = vld.sshfl [vmem:[#allocation1 + $0x8] sm:$0xff pattern:$0x75316420] }
  0x34   :  { %567 = vrot.lane.b32.xlu1 %v558_v26, %s1986_s29  ;;  %1107 = vst [vmem:[#allocation1] ss:$2 sm:$0xff] %v2027_v1 }
  0x35   :  { %569 = vrot.lane.b32.xlu2 %v559_v27, %s1986_s29  ;;  %v933_v48 = vld.sshfl [vmem:[#allocation1 + $0x28] sm:$0xff pattern:$0x75316420]  ;;  %v932_v49 = vld.sshfl [vmem:[#allocation1 + $0x20] sm:$0xff pattern:$0x75316420] }
  0x36   :  { %1111 = vst [vmem:[#allocation1 + $0x20] ss:$2 sm:$0xff] %v2036_v3  ;;  %v1120_v59 = vld.sshfl [vmem:[#allocation1 + $0x30] sm:$0xff pattern:$0x75316420] }
  0x37   :  { %1299 = vst [vmem:[#allocation1 + $0x30] ss:$2 sm:$0xff] %v1286_v58 }
  0x39   :  { %v1117_v54 = vld.sshfl [vmem:[#allocation1 + $0x18] sm:$0xff pattern:$0x75316420]  ;;  %v1116_v55 = vld.sshfl [vmem:[#allocation1 + $0x10] sm:$0xff pattern:$0x75316420] }
  0x3a   :  { %1295 = vst [vmem:[#allocation1 + $0x10] ss:$2 sm:$0xff] %v2022_v0 }
  0x3b   :  { %571 = vrot.lane.b32.xlu0 %v560_v29, %s1986_s29  ;;  %v1115_v50 = vld.sshfl [vmem:[#allocation1 + $0x8] sm:$0xff pattern:$0x75316420]  ;;  %v1114_v53 = vld.sshfl [vmem:[#allocation1] sm:$0xff pattern:$0x75316420] }
  0x3c   :  { %573 = vrot.lane.b32.xlu1 %v561_v28, %s1986_s29  ;;  %1293 = vst [vmem:[#allocation1] ss:$2 sm:$0xff] %v2027_v1 }
  0x3d   :  { %575 = vrot.lane.b32.xlu2 %v562_v35, %s1986_s29  ;;  %v1119_v51 = vld.sshfl [vmem:[#allocation1 + $0x28] sm:$0xff pattern:$0x75316420]  ;;  %v1118_v52 = vld.sshfl [vmem:[#allocation1 + $0x20] sm:$0xff pattern:$0x75316420] }
  0x3e   :  { %1297 = vst [vmem:[#allocation1 + $0x20] ss:$2 sm:$0xff] %v2036_v3 }
  0x41   :  { %v1303_v62 = vld.sshfl [vmem:[#allocation1 + $0x18] sm:$0xff pattern:$0x75316420]  ;;  %v1302_v63 = vld.sshfl [vmem:[#allocation1 + $0x10] sm:$0xff pattern:$0x75316420] }
  0x42   :  { %1481 = vst [vmem:[#allocation1 + $0x10] ss:$2 sm:$0xff] %v2022_v0 }
  0x43   :  { %749 = vrot.lane.b32.xlu0 %v742_v33, %s1987_s8  ;;  %v1301_v56 = vld.sshfl [vmem:[#allocation1 + $0x8] sm:$0xff pattern:$0x75316420]  ;;  %v1300_v57 = vld.sshfl [vmem:[#allocation1] sm:$0xff pattern:$0x75316420] }
  0x44   :  { %751 = vrot.lane.b32.xlu1 %v743_v32, %s1987_s8  ;;  %1479 = vst [vmem:[#allocation1] ss:$2 sm:$0xff] %v2027_v1  ;;  %v1306_v1 = vld.sshfl [vmem:[#allocation1 + $0x30] sm:$0xff pattern:$0x75316420] }
  0x45   :  { %753 = vrot.lane.b32.xlu2 %v744_v37, %s1987_s8  ;;  %1485 = vst [vmem:[#allocation1 + $0x30] ss:$2 sm:$0xff] %v1472_v61  ;;  %v1304_v4 = vld.sshfl [vmem:[#allocation1 + $0x20] sm:$0xff pattern:$0x75316420]  ;;  %v1855_v37 = vld [vmem:[%s2327_s1 + $0x10] sm:$0xff] }
  0x46   :  { %v1305_v5 = vld.sshfl [vmem:[#allocation1 + $0x28] sm:$0xff pattern:$0x75316420] }
  0x47   :  { %1483 = vst [vmem:[#allocation1 + $0x20] ss:$2 sm:$0xff] %v2036_v3 }
  0x4b   :  { %755 = vrot.lane.b32.xlu0 %v745_v36, %s1987_s8  ;;  %v1486_v23 = vld.sshfl [vmem:[#allocation1] sm:$0xff pattern:$0x75316420]  ;;  %v1487_v24 = vld.sshfl [vmem:[#allocation1 + $0x8] sm:$0xff pattern:$0x75316420] }
  0x4c   :  { %757 = vrot.lane.b32.xlu1 %v746_v40, %s1987_s8  ;;  %v1492_v35 = vld.sshfl [vmem:[#allocation1 + $0x30] sm:$0xff pattern:$0x75316420] }
  0x4d   :  { %759 = vrot.lane.b32.xlu2 %v747_v43, %s1987_s8 }
  0x4e   :  { %v1490_v28 = vld.sshfl [vmem:[#allocation1 + $0x20] sm:$0xff pattern:$0x75316420]  ;;  %v1491_v34 = vld.sshfl [vmem:[#allocation1 + $0x28] sm:$0xff pattern:$0x75316420] }
  0x53   :  { %761 = vrot.lane.b32.xlu0 %v748_v39, %s1987_s8 }
  0x54   :  { %935 = vrot.lane.b32.xlu1 %v928_v46, %s1988_s11 }
  0x55   :  { %937 = vrot.lane.b32.xlu2 %v929_v47, %s1988_s11 }
  0x5b   :  { %939 = vrot.lane.b32.xlu0 %v930_v41, %s1988_s11 }
  0x5c   :  { %941 = vrot.lane.b32.xlu1 %v931_v42, %s1988_s11 }
  0x5d   :  { %943 = vrot.lane.b32.xlu2 %v932_v49, %s1988_s11 }
  0x63   :  { %945 = vrot.lane.b32.xlu0 %v933_v48, %s1988_s11 }
  0x64   :  { %947 = vrot.lane.b32.xlu1 %v934_v44, %s1988_s11 }
  0x65   :  { %1121 = vrot.lane.b32.xlu2 %v1114_v53, %s1989_s14 }
  0x67   :  { %v55_v60 = vpop.permute.xlu2 %54 }
  0x6b   :  { %1123 = vrot.lane.b32.xlu0 %v1115_v50, %s1989_s14 }
  0x6c   :  { %1125 = vrot.lane.b32.xlu1 %v1116_v55, %s1989_s14 }
  0x6d   :  { %1127 = vrot.lane.b32.xlu2 %v1117_v54, %s1989_s14 }
  0x6f   :  { %v57_v2 = vpop.permute.xlu2 %56 }
  0x70   :  { %v65_v22 = vsel %vm60_vm1, %v55_v60, %v57_v2 }
  0x73   :  { %1129 = vrot.lane.b32.xlu0 %v1118_v52, %s1989_s14 }
  0x74   :  { %1131 = vrot.lane.b32.xlu1 %v1119_v51, %s1989_s14 }
  0x75   :  { %1133 = vrot.lane.b32.xlu2 %v1120_v59, %s1989_s14 }
  0x77   :  { %v2097_v6 = vpop.permute.xlu2 %379 }
  0x7b   :  { %1307 = vrot.lane.b32.xlu0 %v1300_v57, %s1990_s17  ;;  %v1881_v57 = vld [vmem:[%s2327_s1 + $0x20] sm:$0xff] }
  0x7c   :  { %1309 = vrot.lane.b32.xlu1 %v1301_v56, %s1990_s17  ;;  %v51_v7 = vpop.permute.xlu1 %50 }
  0x7d   :  { %v47_v8 = vpop.permute.xlu0 %46  ;;  %1311 = vrot.lane.b32.xlu2 %v1302_v63, %s1990_s17 }
  0x7f   :  { %v2102_v0 = vpop.permute.xlu2 %385 }
  0x83   :  { %1313 = vrot.lane.b32.xlu0 %v1303_v62, %s1990_s17 }
  0x84   :  { %1315 = vrot.lane.b32.xlu1 %v1304_v4, %s1990_s17  ;;  %v53_v9 = vpop.permute.xlu1 %52 }
  0x85   :  { %v49_v3 = vpop.permute.xlu0 %48  ;;  %v63_v10 = vsel %vm60_vm1, %v51_v7, %v53_v9  ;;  %v64_v11 = vsel %vm60_vm1, %v53_v9, %v55_v60  ;;  %1317 = vrot.lane.b32.xlu2 %v1305_v5, %s1990_s17 }
  0x86   :  { %v61_v19 = vsel %vm60_vm1, %v47_v8, %v49_v3  ;;  %v62_v20 = vsel %vm60_vm1, %v49_v3, %v51_v7  ;;  %1835 = vmatpush.msk.msra.mxu2 %vm71_vm0, %v63_v10  ;;  %1837 = vmatpush.msk.msra.mxu3 %vm71_vm0, %v64_v11  ;;  %v1894_v7 = vld [vmem:[%s2327_s1 + $0x28] sm:$0xff] }
  0x87   :  { %1831 = vmatpush.msk.msra.mxu0 %vm71_vm0, %v61_v19  ;;  %1833 = vmatpush.msk.msra.mxu1 %vm71_vm0, %v62_v20  ;;  %v2118_v21 = vpop.permute.xlu2 %563 }
  0x88   :  { %1832 = vmatmul.msk.f32.vlgmr.msra.gmra.mxu0 %vm67_vm2, %v1830_v18  ;;  %1834 = vmatmul.msk.f32.vlgmr.msra.gmra.mxu1 %vm67_vm2, %v1830_v18 }
  0x89   :  { %1836 = vmatmul.msk.f32.vlgmr.msra.gmra.mxu2 %vm67_vm2, %v1830_v18  ;;  %1839 = vmatpush.msk.msrb.mxu0 %vm71_vm0, %v65_v22 }
  0x8a   :  { %1838 = vmatmul.msk.f32.vlgmr.msra.gmra.mxu3 %vm67_vm2, %v1830_v18  ;;  %1843 = vmatpush.msk.msrb.mxu2 %vm71_vm0, %v2051_v14 }
  0x8b   :  { %1319 = vrot.lane.b32.xlu0 %v1306_v1, %s1990_s17  ;;  %1847 = vmatpush.msk.msra.mxu0 %vm71_vm0, %v2046_v12  ;;  %v21_v12 = vld [vmem:[%s2327_s1] sm:$0xff]  ;;  %s1821_s17 = sshll.u32 %s2330_s4, 4  ;;  %s1822_s17 = int_to_ptr.hbm [resolvable:$true] %s1821_s17 }
  0x8c   :  { %1493 = vrot.lane.b32.xlu1 %v1486_v23, %s1991_s19  ;;  %1845 = vmatpush.msk.msrb.mxu3 %vm71_vm0, %v2053_v15 }
  0x8d   :  { %v59_v25 = vpop.permute.xlu0 %58  ;;  %1851 = vmatpush.msk.msra.mxu2 %vm71_vm0, %v2056_v16  ;;  %1495 = vrot.lane.b32.xlu2 %v1487_v24, %s1991_s19  ;;  %v1488_v16 = vld.sshfl [vmem:[#allocation1 + $0x10] sm:$0xff pattern:$0x75316420] }
  0x8e   :  { %1853 = vmatpush.msk.msra.mxu3 %vm71_vm0, %v2058_v17  ;;  %v378_v14 = vpop.permute.xlu1 %377  ;;  %v66_v26 = vsel %vm60_vm1, %v57_v2, %v59_v25  ;;  %v1489_v17 = vld.sshfl [vmem:[#allocation1 + $0x18] sm:$0xff pattern:$0x75316420] }
  0x8f   :  { %v392_v27 = vsel %vm391_vm3, %v378_v14, %v2097_v6  ;;  %1841 = vmatpush.msk.msrb.mxu1 %vm71_vm0, %v66_v26  ;;  %v570_v15 = vpop.permute.xlu2 %569 }
  0x90   :  { %1840 = vmatmul.msk.f32.vlgmr.msrb.gmra.mxu0 %vm67_vm2, %v1830_v18  ;;  %1842 = vmatmul.msk.f32.vlgmr.msrb.gmra.mxu1 %vm67_vm2, %v1830_v18 }
  0x91   :  { %1844 = vmatmul.msk.f32.vlgmr.msrb.gmra.mxu2 %vm67_vm2, %v21_v12  ;;  %1856 = vmatpush.msk.msrb.mxu0 %vm71_vm0, %v392_v27 }
  0x92   :  { %1846 = vmatmul.msk.f32.vlgmr.msrb.gmra.mxu3 %vm67_vm2, %v21_v12  ;;  %1849 = vmatpush.msk.msra.mxu1 %vm71_vm0, %v2048_v13 }
  0x93   :  { %1497 = vrot.lane.b32.xlu0 %v1488_v16, %s1991_s19 }
  0x94   :  { %1499 = vrot.lane.b32.xlu1 %v1489_v17, %s1991_s19 }
  0x95   :  { %v382_v29 = vpop.permute.xlu0 %381  ;;  %1501 = vrot.lane.b32.xlu2 %v1490_v28, %s1991_s19 }
  0x96   :  { %v393_v30 = vsel %vm391_vm3, %v2097_v6, %v382_v29  ;;  %v384_v31 = vpop.permute.xlu1 %383 }
  0x97   :  { %v394_v32 = vsel %vm391_vm3, %v382_v29, %v384_v31  ;;  %v395_v33 = vsel %vm391_vm3, %v384_v31, %v2102_v0  ;;  %1858 = vmatpush.msk.msrb.mxu1 %vm71_vm0, %v393_v30  ;;  %v576_v13 = vpop.permute.xlu2 %575 }
  0x98   :  { %1860 = vmatpush.msk.msrb.mxu2 %vm71_vm0, %v394_v32  ;;  %1848 = vmatmul.msk.f32.vlgmr.msra.gmra.mxu0 %vm67_vm2, %v21_v12 }
  0x99   :  { %1850 = vmatmul.msk.f32.vlgmr.msra.gmra.mxu1 %vm67_vm2, %v21_v12  ;;  %1852 = vmatmul.msk.f32.vlgmr.msra.gmra.mxu2 %vm67_vm2, %v21_v12 }
  0x9a   :  { %1862 = vmatpush.msk.msrb.mxu3 %vm71_vm0, %v395_v33 }
  0x9b   :  { %1854 = vmatmul.msk.f32.vlgmr.msra.gmra.mxu3 %vm67_vm2, %v21_v12  ;;  %1503 = vrot.lane.b32.xlu0 %v1491_v34, %s1991_s19  ;;  %v1907_v12 = vld [vmem:[%s2327_s1 + $0x30] sm:$0xff] }
  0x9c   :  { %1505 = vrot.lane.b32.xlu1 %v1492_v35, %s1991_s19 }
  0x9d   :  { %v388_v36 = vpop.permute.xlu0 %387 }
  0x9e   :  { %v396_v38 = vsel %vm391_vm3, %v2102_v0, %v388_v36  ;;  %v390_v39 = vpop.permute.xlu1 %389 }
  0x9f   :  { %v397_v40 = vsel %vm391_vm3, %v388_v36, %v390_v39  ;;  %1864 = vmatpush.msk.msra.mxu0 %vm71_vm0, %v396_v38  ;;  %v754_v41 = vpop.permute.xlu2 %753 }
  0xa0   :  { %1866 = vmatpush.msk.msra.mxu1 %vm71_vm0, %v397_v40  ;;  %1857 = vmatmul.msk.f32.vlgmr.msrb.gmra.mxu0 %vm67_vm2, %v1855_v37 }
  0xa1   :  { %1859 = vmatmul.msk.f32.vlgmr.msrb.gmra.mxu1 %vm67_vm2, %v1855_v37  ;;  %1861 = vmatmul.msk.f32.vlgmr.msrb.gmra.mxu2 %vm67_vm2, %v1855_v37 }
  0xa3   :  { %1863 = vmatmul.msk.f32.vlgmr.msrb.gmra.mxu3 %vm67_vm2, %v1855_v37 }
  0xa5   :  { %v566_v42 = vpop.permute.xlu0 %565 }
  0xa6   :  { %v568_v43 = vpop.permute.xlu1 %567  ;;  %v578_v44 = vsel %vm577_vm4, %v2118_v21, %v566_v42 }
  0xa7   :  { %v579_v46 = vsel %vm577_vm4, %v566_v42, %v568_v43  ;;  %v580_v47 = vsel %vm577_vm4, %v568_v43, %v570_v15  ;;  %1869 = vmatpush.msk.msra.mxu2 %vm71_vm0, %v578_v44  ;;  %v760_v48 = vpop.permute.xlu2 %759 }
  0xa8   :  { %1871 = vmatpush.msk.msra.mxu3 %vm71_vm0, %v579_v46  ;;  %1865 = vmatmul.msk.f32.vlgmr.msra.gmra.mxu0 %vm67_vm2, %v1855_v37  ;;  %v1933_v46 = vld [vmem:[%s2327_s1 + $0x40] sm:$0xff] }
  0xa9   :  { %1867 = vmatmul.msk.f32.vlgmr.msra.gmra.mxu1 %vm67_vm2, %v1855_v37  ;;  %1870 = vmatmul.msk.f32.vlgmr.msra.gmra.mxu2 %vm67_vm2, %v1868_v45 }
  0xaa   :  { %1873 = vmatpush.msk.msrb.mxu0 %vm71_vm0, %v580_v47 }
  0xab   :  { %1872 = vmatmul.msk.f32.vlgmr.msra.gmra.mxu3 %vm67_vm2, %v1868_v45 }
  0xad   :  { %v572_v49 = vpop.permute.xlu0 %571 }
  0xae   :  { %v574_v50 = vpop.permute.xlu1 %573  ;;  %v581_v51 = vsel %vm577_vm4, %v570_v15, %v572_v49 }
  0xaf   :  { %v582_v52 = vsel %vm577_vm4, %v572_v49, %v574_v50  ;;  %v583_v53 = vsel %vm577_vm4, %v574_v50, %v576_v13  ;;  %1875 = vmatpush.msk.msrb.mxu1 %vm71_vm0, %v581_v51  ;;  %v938_v54 = vpop.permute.xlu2 %937  ;;  %v1920_v13 = vld [vmem:[%s2327_s1 + $0x38] sm:$0xff] }
  0xb0   :  { %1877 = vmatpush.msk.msrb.mxu2 %vm71_vm0, %v582_v52  ;;  %1874 = vmatmul.msk.f32.vlgmr.msrb.gmra.mxu0 %vm67_vm2, %v1868_v45 }
  0xb1   :  { %1876 = vmatmul.msk.f32.vlgmr.msrb.gmra.mxu1 %vm67_vm2, %v1868_v45  ;;  %1878 = vmatmul.msk.f32.vlgmr.msrb.gmra.mxu2 %vm67_vm2, %v1868_v45 }
  0xb2   :  { %1879 = vmatpush.msk.msrb.mxu3 %vm71_vm0, %v583_v53  ;;  %v1992_v53 = vmov 0  }
  0xb3   :  { %1880 = vmatmul.msk.f32.vlgmr.msrb.gmra.mxu3 %vm67_vm2, %v1868_v45  ;;  %1956 = vset.pattern.permute.xlu2 %v1992_v53 }
  0xb4   :  { %1957 = vset.pattern.permute.xlu0 %v1992_v53 }
  0xb5   :  { %v750_v55 = vpop.permute.xlu0 %749 }
  0xb6   :  { %v752_v56 = vpop.permute.xlu1 %751 }
  0xb7   :  { %v765_v58 = vsel %vm763_vm5, %v752_v56, %v754_v41  ;;  %v764_v59 = vsel %vm763_vm5, %v750_v55, %v752_v56  ;;  %v944_v63 = vpop.permute.xlu2 %943 }
  0xb8   :  { %1882 = vmatpush.msk.msra.mxu0 %vm71_vm0, %v764_v59  ;;  %1884 = vmatpush.msk.msra.mxu1 %vm71_vm0, %v765_v58 }
  0xb9   :  { %1883 = vmatmul.msk.f32.vlgmr.msra.gmra.mxu0 %vm67_vm2, %v1881_v57  ;;  %1885 = vmatmul.msk.f32.vlgmr.msra.gmra.mxu1 %vm67_vm2, %v1881_v57 }
  0xbd   :  { %v756_v60 = vpop.permute.xlu0 %755 }
  0xbe   :  { %v758_v61 = vpop.permute.xlu1 %757  ;;  %v766_v62 = vsel %vm763_vm5, %v754_v41, %v756_v60 }
  0xbf   :  { %v768_v1 = vsel %vm763_vm5, %v758_v61, %v760_v48  ;;  %v767_v2 = vsel %vm763_vm5, %v756_v60, %v758_v61  ;;  %1886 = vmatpush.msk.msra.mxu2 %vm71_vm0, %v766_v62  ;;  %v1122_v0 = vpop.permute.xlu2 %1121 }
  0xc0   :  { %1888 = vmatpush.msk.msra.mxu3 %vm71_vm0, %v767_v2  ;;  %1890 = vmatpush.msk.msrb.mxu0 %vm71_vm0, %v768_v1 }
  0xc1   :  { %1887 = vmatmul.msk.f32.vlgmr.msra.gmra.mxu2 %vm67_vm2, %v1881_v57  ;;  %1889 = vmatmul.msk.f32.vlgmr.msra.gmra.mxu3 %vm67_vm2, %v1881_v57 }
  0xc2   :  { %1891 = vmatmul.msk.f32.vlgmr.msrb.gmra.mxu0 %vm67_vm2, %v1881_v57 }
  0xc5   :  { %v762_v4 = vpop.permute.xlu0 %761 }
  0xc6   :  { %v769_v5 = vsel %vm763_vm5, %v760_v48, %v762_v4  ;;  %v936_v6 = vpop.permute.xlu1 %935 }
  0xc7   :  { %v950_v8 = vsel %vm949_vm6, %v936_v6, %v938_v54  ;;  %1892 = vmatpush.msk.msrb.mxu1 %vm71_vm0, %v769_v5  ;;  %v1128_v19 = vpop.permute.xlu2 %1127 }
  0xc8   :  { %1895 = vmatpush.msk.msrb.mxu2 %vm71_vm0, %v950_v8  ;;  %1893 = vmatmul.msk.f32.vlgmr.msrb.gmra.mxu1 %vm67_vm2, %v1881_v57  ;;  %v1655_v57 = vld [vmem:[%s2328_s2] sm:$0xff] }
  0xc9   :  { %1896 = vmatmul.msk.f32.vlgmr.msrb.gmra.mxu2 %vm67_vm2, %v1894_v7  ;;  %1658 = vperm.xlu2 %1956, %v1655_v57  }
  0xcd   :  { %v940_v9 = vpop.permute.xlu0 %939 }
  0xce   :  { %v951_v3 = vsel %vm949_vm6, %v938_v54, %v940_v9  ;;  %v942_v10 = vpop.permute.xlu1 %941 }
  0xcf   :  { %v952_v11 = vsel %vm949_vm6, %v940_v9, %v942_v10  ;;  %v953_v18 = vsel %vm949_vm6, %v942_v10, %v944_v63  ;;  %1897 = vmatpush.msk.msrb.mxu3 %vm71_vm0, %v951_v3  ;;  %v1134_v24 = vpop.permute.xlu2 %1133 }
  0xd0   :  { %1899 = vmatpush.msk.msra.mxu0 %vm71_vm0, %v952_v11  ;;  %1901 = vmatpush.msk.msra.mxu1 %vm71_vm0, %v953_v18 }
  0xd1   :  { %1898 = vmatmul.msk.f32.vlgmr.msrb.gmra.mxu3 %vm67_vm2, %v1894_v7  ;;  %1900 = vmatmul.msk.f32.vlgmr.msra.gmra.mxu0 %vm67_vm2, %v1894_v7 }
  0xd2   :  { %1902 = vmatmul.msk.f32.vlgmr.msra.gmra.mxu1 %vm67_vm2, %v1894_v7 }
  0xd5   :  { %v946_v20 = vpop.permute.xlu0 %945 }
  0xd6   :  { %v954_v21 = vsel %vm949_vm6, %v944_v63, %v946_v20  ;;  %v948_v22 = vpop.permute.xlu1 %947 }
  0xd7   :  { %v955_v23 = vsel %vm949_vm6, %v946_v20, %v948_v22  ;;  %1903 = vmatpush.msk.msra.mxu2 %vm71_vm0, %v954_v21  ;;  %v1312_v29 = vpop.permute.xlu2 %1311 }
  0xd8   :  { %1905 = vmatpush.msk.msra.mxu3 %vm71_vm0, %v955_v23  ;;  %1904 = vmatmul.msk.f32.vlgmr.msra.gmra.mxu2 %vm67_vm2, %v1894_v7 }
  0xd9   :  { %1906 = vmatmul.msk.f32.vlgmr.msra.gmra.mxu3 %vm67_vm2, %v1894_v7 }
  0xdd   :  { %v1124_v25 = vpop.permute.xlu0 %1123 }
  0xde   :  { %v1126_v14 = vpop.permute.xlu1 %1125  ;;  %v1136_v26 = vsel %vm1135_vm7, %v1122_v0, %v1124_v25 }
  0xdf   :  { %v1137_v27 = vsel %vm1135_vm7, %v1124_v25, %v1126_v14  ;;  %v1138_v15 = vsel %vm1135_vm7, %v1126_v14, %v1128_v19  ;;  %1908 = vmatpush.msk.msrb.mxu0 %vm71_vm0, %v1136_v26  ;;  %v1318_v36 = vpop.permute.xlu2 %1317 }
  0xe0   :  { %1910 = vmatpush.msk.msrb.mxu1 %vm71_vm0, %v1137_v27  ;;  %1912 = vmatpush.msk.msrb.mxu2 %vm71_vm0, %v1138_v15 }
  0xe1   :  { %1909 = vmatmul.msk.f32.vlgmr.msrb.gmra.mxu0 %vm67_vm2, %v1907_v12  ;;  %1911 = vmatmul.msk.f32.vlgmr.msrb.gmra.mxu1 %vm67_vm2, %v1907_v12 }
  0xe2   :  { %1913 = vmatmul.msk.f32.vlgmr.msrb.gmra.mxu2 %vm67_vm2, %v1907_v12 }
  0xe5   :  { %v1130_v16 = vpop.permute.xlu0 %1129 }
  0xe6   :  { %v1132_v17 = vpop.permute.xlu1 %1131  ;;  %v1139_v28 = vsel %vm1135_vm7, %v1128_v19, %v1130_v16 }
  0xe7   :  { %v1140_v30 = vsel %vm1135_vm7, %v1130_v16, %v1132_v17  ;;  %v1141_v31 = vsel %vm1135_vm7, %v1132_v17, %v1134_v24  ;;  %1914 = vmatpush.msk.msrb.mxu3 %vm71_vm0, %v1139_v28  ;;  %v1496_v42 = vpop.permute.xlu2 %1495 }
  0xe8   :  { %1916 = vmatpush.msk.msra.mxu0 %vm71_vm0, %v1140_v30  ;;  %1918 = vmatpush.msk.msra.mxu1 %vm71_vm0, %v1141_v31 }
  0xe9   :  { %1915 = vmatmul.msk.f32.vlgmr.msrb.gmra.mxu3 %vm67_vm2, %v1907_v12  ;;  %1917 = vmatmul.msk.f32.vlgmr.msra.gmra.mxu0 %vm67_vm2, %v1907_v12 }
  0xea   :  { %1919 = vmatmul.msk.f32.vlgmr.msra.gmra.mxu1 %vm67_vm2, %v1907_v12 }
  0xed   :  { %v1308_v32 = vpop.permute.xlu0 %1307 }
  0xee   :  { %v1310_v33 = vpop.permute.xlu1 %1309 }
  0xef   :  { %v1323_v34 = vsel %vm1321_vm8, %v1310_v33, %v1312_v29  ;;  %v1322_v35 = vsel %vm1321_vm8, %v1308_v32, %v1310_v33  ;;  %v1502_v48 = vpop.permute.xlu2 %1501 }
  0xf0   :  { %1921 = vmatpush.msk.msra.mxu2 %vm71_vm0, %v1322_v35  ;;  %1923 = vmatpush.msk.msra.mxu3 %vm71_vm0, %v1323_v34 }
  0xf1   :  { %1922 = vmatmul.msk.f32.vlgmr.msra.gmra.mxu2 %vm67_vm2, %v1920_v13  ;;  %1924 = vmatmul.msk.f32.vlgmr.msra.gmra.mxu3 %vm67_vm2, %v1920_v13 }
  0xf5   :  { %v1314_v37 = vpop.permute.xlu0 %1313 }
  0xf6   :  { %v1316_v38 = vpop.permute.xlu1 %1315  ;;  %v1324_v39 = vsel %vm1321_vm8, %v1312_v29, %v1314_v37 }
  0xf7   :  { %v1326_v40 = vsel %vm1321_vm8, %v1316_v38, %v1318_v36  ;;  %v1325_v41 = vsel %vm1321_vm8, %v1314_v37, %v1316_v38  ;;  %1925 = vmatpush.msk.msrb.mxu0 %vm71_vm0, %v1324_v39  ;;  %v1673_v39 = vld [vmem:[%s2329_s3] sm:$0xff] }
  0xf8   :  { %1927 = vmatpush.msk.msrb.mxu1 %vm71_vm0, %v1325_v41  ;;  %1929 = vmatpush.msk.msrb.mxu2 %vm71_vm0, %v1326_v40  ;;  %1677 = vst [vmem:[#allocation1] ss:$4 sm:$0xff] %v1673_v39 }
  0xf9   :  { %1926 = vmatmul.msk.f32.vlgmr.msrb.gmra.mxu0 %vm67_vm2, %v1920_v13  ;;  %1928 = vmatmul.msk.f32.vlgmr.msrb.gmra.mxu1 %vm67_vm2, %v1920_v13 }
  0xfa   :  { %1930 = vmatmul.msk.f32.vlgmr.msrb.gmra.mxu2 %vm67_vm2, %v1920_v13 }
  0xfd   :  { %v1320_v43 = vpop.permute.xlu0 %1319 }
  0xfe   :  { %v1327_v44 = vsel %vm1321_vm8, %v1318_v36, %v1320_v43  ;;  %v1494_v45 = vpop.permute.xlu1 %1493 }
  0xff   :  { %v1508_v47 = vsel %vm1507_vm9, %v1494_v45, %v1496_v42  ;;  %1931 = vmatpush.msk.msrb.mxu3 %vm71_vm0, %v1327_v44  ;;  %v1674_v45 = vld [vmem:[%s2329_s3 + $0x8] sm:$0xf]  ;;  %s1993_s3 = smov [#allocation2]  }
 0x100   :  { %1934 = vmatpush.msk.msra.mxu0 %vm71_vm0, %v1508_v47  ;;  %1932 = vmatmul.msk.f32.vlgmr.msrb.gmra.mxu3 %vm67_vm2, %v1920_v13  ;;  %1679 = vst [vmem:[#allocation1 + $0x20] ss:$4 sm:$0xff] %v1674_v45  ;;  %s1819_s14 = sshll.u32 %s1993_s3, 4  ;;  %s1820_s14 = int_to_ptr.vmem [resolvable:$true] %s1819_s14 }
 0x101   :  { %1935 = vmatmul.msk.f32.vlgmr.msra.gmra.mxu0 %vm67_vm2, %v1933_v46 }
 0x105   :  { %v2296_v49 = vpop.f32.mrf.mxu0  ;;  %v121_v50 = vpop.f32.mrf.mxu1 }
 0x106   :  { %v1498_v51 = vpop.permute.xlu0 %1497  ;;  %v1500_v52 = vpop.permute.xlu1 %1499 }
 0x107   :  { %v1509_v54 = vsel %vm1507_vm9, %v1496_v42, %v1498_v51  ;;  %v1510_v55 = vsel %vm1507_vm9, %v1498_v51, %v1500_v52  ;;  %v1511_v56 = vsel %vm1507_vm9, %v1500_v52, %v1502_v48 }
 0x108   :  { %1936 = vmatpush.msk.msra.mxu1 %vm71_vm0, %v1509_v54  ;;  %1938 = vmatpush.msk.msra.mxu2 %vm71_vm0, %v1510_v55 }
 0x109   :  { %1940 = vmatpush.msk.msra.mxu3 %vm71_vm0, %v1511_v56  ;;  %1937 = vmatmul.msk.f32.vlgmr.msra.gmra.mxu1 %vm67_vm2, %v1933_v46 }
 0x10a   :  { %1939 = vmatmul.msk.f32.vlgmr.msra.gmra.mxu2 %vm67_vm2, %v1933_v46  ;;  %1941 = vmatmul.msk.f32.vlgmr.msra.gmra.mxu3 %vm67_vm2, %v1933_v46 }
 0x10c   :  { %v141_v58 = vpop.f32.mrf.mxu2 }
 0x10d   :  { %v161_v59 = vpop.f32.mrf.mxu3  ;;  %v181_v60 = vpop.f32.mrf.mxu0 }
 0x10e   :  { %v201_v61 = vpop.f32.mrf.mxu1  ;;  %v1504_v62 = vpop.permute.xlu0 %1503 }
 0x10f   :  { %v1512_v63 = vsel %vm1507_vm9, %v1502_v48, %v1504_v62  ;;  %v1506_v1 = vpop.permute.xlu1 %1505 }
 0x110   :  { %v1513_v2 = vsel %vm1507_vm9, %v1504_v62, %v1506_v1  ;;  %1942 = vmatpush.msk.msrb.mxu0 %vm71_vm0, %v1512_v63 }
 0x111   :  { %1944 = vmatpush.msk.msrb.mxu1 %vm71_vm0, %v1513_v2  ;;  %1943 = vmatmul.msk.f32.vlgmr.msrb.gmra.mxu0 %vm67_vm2, %v1933_v46 }
 0x112   :  { %1945 = vmatmul.msk.f32.vlgmr.msrb.gmra.mxu1 %vm67_vm2, %v1933_v46 }
 0x114   :  { %v250_v4 = vpop.f32.mrf.mxu2 }
 0x115   :  { %v270_v5 = vpop.f32.mrf.mxu3  ;;  %v290_v6 = vpop.f32.mrf.mxu0  ;;  %v251_v42 = vadd.f32 %v250_v4, %v2296_v49 }
 0x116   :  { %v271_v7 = vadd.f32 %v270_v5, %v121_v50  ;;  %v291_v8 = vadd.f32 %v290_v6, %v141_v58  ;;  %v310_v0 = vpop.f32.mrf.mxu1 }
 0x117   :  { %v311_v9 = vadd.f32 %v310_v0, %v161_v59 }
 0x11c   :  { %v330_v3 = vpop.f32.mrf.mxu2 }
 0x11d   :  { %v331_v10 = vadd.f32 %v330_v3, %v181_v60  ;;  %v430_v11 = vpop.f32.mrf.mxu0 }
 0x11e   :  { %v350_v18 = vpop.f32.mrf.mxu3  ;;  %v450_v22 = vpop.f32.mrf.mxu1  ;;  %v533_v46 = vadd.f32 %v430_v11, %v251_v42 }
 0x11f   :  { %v351_v19 = vadd.f32 %v350_v18, %v201_v61  ;;  %v534_v52 = vadd.f32 %v450_v22, %v271_v7  ;;  %v1680_v22 = vld.sshfl [vmem:[#allocation1] sm:$0xff pattern:$0x73625140] }
 0x123   :  { %v1659_v49 = vpop.permute.xlu2 %1658 }
 0x124   :  { %v470_v23 = vpop.f32.mrf.mxu2 }
 0x125   :  { %v510_v20 = vpop.f32.mrf.mxu0  ;;  %v535_v63 = vadd.f32 %v470_v23, %v291_v8 }
 0x126   :  { %v537_v21 = vadd.f32 %v510_v20, %v331_v10  ;;  %v490_v24 = vpop.f32.mrf.mxu3  ;;  %v530_v25 = vpop.f32.mrf.mxu1 }
 0x127   :  { %v536_v1 = vadd.f32 %v490_v24, %v311_v9  ;;  %v538_v5 = vadd.f32 %v530_v25, %v351_v19 }
 0x12c   :  { %v616_v26 = vpop.f32.mrf.mxu2 }
 0x12d   :  { %v656_v14 = vpop.f32.mrf.mxu0  ;;  %v719_v47 = vadd.f32 %v616_v26, %v533_v46 }
 0x12e   :  { %v636_v12 = vpop.f32.mrf.mxu3  ;;  %v676_v27 = vpop.f32.mrf.mxu1  ;;  %v721_v7 = vadd.f32 %v656_v14, %v535_v63 }
 0x12f   :  { %v720_v57 = vadd.f32 %v636_v12, %v534_v52  ;;  %v722_v10 = vadd.f32 %v676_v27, %v536_v1 }
 0x134   :  { %v696_v16 = vpop.f32.mrf.mxu2 }
 0x135   :  { %v723_v11 = vadd.f32 %v696_v16, %v537_v21 }
 0x136   :  { %v802_v15 = vpop.f32.mrf.mxu0  ;;  %v716_v17 = vpop.f32.mrf.mxu3 }
 0x137   :  { %v822_v28 = vpop.f32.mrf.mxu1  ;;  %v905_v51 = vadd.f32 %v802_v15, %v719_v47  ;;  %v724_v26 = vadd.f32 %v716_v17, %v538_v5 }
 0x138   :  { %v906_v61 = vadd.f32 %v822_v28, %v720_v57 }
 0x13f   :  { %v882_v29 = vpop.f32.mrf.mxu0 }
 0x144   :  { %v842_v30 = vpop.f32.mrf.mxu2  ;;  %v862_v31 = vpop.f32.mrf.mxu3 }
 0x145   :  { %v902_v32 = vpop.f32.mrf.mxu1  ;;  %v907_v12 = vadd.f32 %v842_v30, %v721_v7  ;;  %v908_v15 = vadd.f32 %v862_v31, %v722_v10 }
 0x146   :  { %v910_v9 = vadd.f32 %v902_v32, %v724_v26 }
 0x14c   :  { %v988_v34 = vpop.f32.mrf.mxu2 }
 0x14d   :  { %v1091_v53 = vadd.f32 %v988_v34, %v905_v51  ;;  %v909_v34 = vadd.f32 %v882_v29, %v723_v11  ;;  %v1681_v29 = vld.sshfl [vmem:[#allocation1 + $0x8] sm:$0xff pattern:$0x73625140]  ;;  %v1682_v51 = vld.sshfl [vmem:[#allocation1 + $0x10] sm:$0xff pattern:$0x73625140] }
 0x14e   :  { %v1028_v33 = vpop.f32.mrf.mxu0 }
 0x14f   :  { %v1048_v35 = vpop.f32.mrf.mxu1  ;;  %v1093_v23 = vadd.f32 %v1028_v33, %v907_v12 }
 0x150   :  { %v1094_v24 = vadd.f32 %v1048_v35, %v908_v15 }
 0x154   :  { %v1008_v13 = vpop.f32.mrf.mxu3 }
 0x155   :  { %v1092_v2 = vadd.f32 %v1008_v13, %v906_v61 }
 0x15b   :  { %v1068_v37 = vpop.f32.mrf.mxu2 }
 0x15c   :  { %v1088_v38 = vpop.f32.mrf.mxu3  ;;  %v1095_v19 = vadd.f32 %v1068_v37, %v909_v34 }
 0x15d   :  { %v1096_v13 = vadd.f32 %v1088_v38, %v910_v9 }
 0x15e   :  { %v1174_v36 = vpop.f32.mrf.mxu0  ;;  %v1194_v40 = vpop.f32.mrf.mxu1 }
 0x15f   :  { %v1277_v55 = vadd.f32 %v1174_v36, %v1091_v53  ;;  %v1278_v6 = vadd.f32 %v1194_v40, %v1092_v2  ;;  %v1683_v53 = vld.sshfl [vmem:[#allocation1 + $0x18] sm:$0xff pattern:$0x73625140] }
 0x165   :  { %v1214_v44 = vpop.f32.mrf.mxu2 }
 0x166   :  { %v1254_v41 = vpop.f32.mrf.mxu0  ;;  %v1279_v14 = vadd.f32 %v1214_v44, %v1093_v23 }
 0x167   :  { %v1274_v48 = vpop.f32.mrf.mxu1  ;;  %v1281_v21 = vadd.f32 %v1254_v41, %v1095_v19 }
 0x168   :  { %v1282_v36 = vadd.f32 %v1274_v48, %v1096_v13 }
 0x16c   :  { %v1234_v43 = vpop.f32.mrf.mxu3 }
 0x16d   :  { %v1280_v27 = vadd.f32 %v1234_v43, %v1094_v24 }
 0x174   :  { %v1360_v54 = vpop.f32.mrf.mxu2  ;;  %v1380_v56 = vpop.f32.mrf.mxu3 }
 0x175   :  { %v1463_v58 = vadd.f32 %v1360_v54, %v1277_v55  ;;  %v1464_v18 = vadd.f32 %v1380_v56, %v1278_v6  ;;  %v1684_v54 = vld.sshfl [vmem:[#allocation1 + $0x20] sm:$0xff pattern:$0x73625140]  ;;  %v1685_v55 = vld.sshfl [vmem:[#allocation1 + $0x28] sm:$0xff pattern:$0x73625140] }
 0x176   :  { %v1400_v50 = vpop.f32.mrf.mxu0  ;;  %v1420_v59 = vpop.f32.mrf.mxu1 }
 0x177   :  { %v1465_v39 = vadd.f32 %v1400_v50, %v1279_v14  ;;  %v1466_v40 = vadd.f32 %v1420_v59, %v1280_v27 }
 0x17d   :  { %v1440_v20 = vpop.f32.mrf.mxu2 }
 0x17e   :  { %v1546_v60 = vpop.f32.mrf.mxu0  ;;  %v1467_v17 = vadd.f32 %v1440_v20, %v1281_v21 }
 0x17f   :  { %v1649_v62 = vadd.f32 %v1546_v60, %v1463_v58 }
 0x181   :  { %v1661_v4 = vadd.f32 %v1659_v49, %v1649_v62 }
 0x183   :  { %v1460_v0 = vpop.f32.mrf.mxu3  ;;  %v1667_v3 = vmax.f32 %v1661_v4, 0.0 }
 0x184   :  { %v1468_v42 = vadd.f32 %v1460_v0, %v1282_v36 }
 0x185   :  { %1707 = vmatpush.xpose.msrb.mxu2 %v1667_v3 }
 0x186   :  { %v1566_v28 = vpop.f32.mrf.mxu1 }
 0x187   :  { %v1650_v8 = vadd.f32 %v1566_v28, %v1464_v18 }
 0x188   :  { %1708 = vmatmul.f32.vlgmr.msrb.gmra.mxu2 %v1680_v22 }
 0x189   :  { %v1662_v25 = vadd.f32 %v1659_v49, %v1650_v8 }
 0x18b   :  { %v1668_v16 = vmax.f32 %v1662_v25, 0.0 }
 0x18d   :  { %v1586_v30 = vpop.f32.mrf.mxu2  ;;  %v1606_v31 = vpop.f32.mrf.mxu3  ;;  %1727 = vmatpush.xpose.msrb.mxu3 %v1668_v16 }
 0x18e   :  { %v1651_v32 = vadd.f32 %v1586_v30, %v1465_v39  ;;  %v1652_v33 = vadd.f32 %v1606_v31, %v1466_v40  ;;  %v1626_v35 = vpop.f32.mrf.mxu0 }
 0x18f   :  { %v1653_v45 = vadd.f32 %v1626_v35, %v1467_v17  ;;  %v1646_v37 = vpop.f32.mrf.mxu1 }
 0x190   :  { %v1663_v46 = vadd.f32 %v1659_v49, %v1651_v32  ;;  %v1664_v38 = vadd.f32 %v1659_v49, %v1652_v33  ;;  %v1654_v44 = vadd.f32 %v1646_v37, %v1468_v42  ;;  %1728 = vmatmul.f32.vlgmr.msrb.gmra.mxu3 %v1681_v29 }
 0x191   :  { %v1665_v41 = vadd.f32 %v1659_v49, %v1653_v45 }
 0x192   :  { %v1669_v43 = vmax.f32 %v1663_v46, 0.0  ;;  %v1670_v47 = vmax.f32 %v1664_v38, 0.0  ;;  %v1666_v48 = vadd.f32 %v1659_v49, %v1654_v44 }
 0x193   :  { %v1671_v50 = vmax.f32 %v1665_v41, 0.0 }
 0x194   :  { %v1672_v52 = vmax.f32 %v1666_v48, 0.0  ;;  %1747 = vmatpush.xpose.msra.mxu0 %v1669_v43  ;;  %1767 = vmatpush.xpose.msra.mxu1 %v1670_v47 }
 0x195   :  { %1787 = vmatpush.xpose.msra.mxu2 %v1671_v50 }
 0x196   :  { %1807 = vmatpush.xpose.msra.mxu3 %v1672_v52 }
 0x197   :  { %1748 = vmatmul.f32.vlgmr.msra.gmra.mxu0 %v1682_v51  ;;  %1768 = vmatmul.f32.vlgmr.msra.gmra.mxu1 %v1683_v53 }
 0x198   :  { %1788 = vmatmul.f32.vlgmr.msra.gmra.mxu2 %v1684_v54 }
 0x199   :  { %1808 = vmatmul.f32.vlgmr.msra.gmra.mxu3 %v1685_v55 }
 0x20b   :  { %v1709_v56 = vpop.f32.mrf.mxu2 }
 0x213   :  { %v1729_v57 = vpop.f32.mrf.mxu3 }
 0x214   :  { %v1730_v58 = vadd.f32 %v1729_v57, %v1709_v56  ;;  %v1749_v59 = vpop.f32.mrf.mxu0  ;;  %v1769_v49 = vpop.f32.mrf.mxu1 }
 0x216   :  { %v1750_v60 = vadd.f32 %v1749_v59, %v1730_v58 }
 0x218   :  { %v1770_v61 = vadd.f32 %v1769_v49, %v1750_v60 }
 0x21b   :  { %v1789_v62 = vpop.f32.mrf.mxu2 }
 0x21c   :  { %v1790_v63 = vadd.f32 %v1789_v62, %v1770_v61  ;;  %v1809_v1 = vpop.f32.mrf.mxu3 }
 0x21e   :  { %v1810_v2 = vadd.f32 %v1809_v1, %v1790_v63 }
 0x220   :  { %1813 = vst.msk [vmem:[#allocation2] sm:$0x3] %vm1812_vm10, %v1810_v2 }
 0x221   :  { %1824 = dma.vmem_to_hbm [thread:$0]  %s1820_s14, 32, %s1822_s17, [#allocation3]  }
 0x222   :  { %1982 = dma.done.wait [#allocation3], 32  }
 0x223   :  { %1983 = vsyncadd [#allocation3], 4294967264 }
 0x224   :  { %1829 = vsyncpa [#allocation3], 1 }

</bundles_post_ra>
